<compile_context>
chip_gen: v7x
topology: tpu7x:2x2x1
jax: 0.10.0
libtpu: 0.0.40
codegen_flags: <defaults>
</compile_context>

<pallas_src>
import functools

import jax
import jax.numpy as jnp
from jax.experimental import pallas as pl
from jax.experimental.pallas import tpu as pltpu


def _int_pow(x, n):
    """x**n for a static positive integer n via exponentiation by squaring."""
    result = None
    cur = x
    while n:
        if n & 1:
            result = cur if result is None else result * cur
        n >>= 1
        if n:
            cur = cur * cur
    return result


def _neg_coef(exp_shifted, inv, gamma_neg, smooth):
    """(eps/C) * p**gamma_neg with p = exp_shifted * inv.

    On the integer-gamma fast path p is never materialized: inv**n folds into
    a per-row (TB, 1) scale so only exp_shifted**n is full-tile work.
    """
    g = float(gamma_neg)
    if smooth == 0.0:            # eps == 0: off-target smoothing weight is 0
        return jnp.float32(0.0)
    if g == 0.0:
        return jnp.float32(smooth)
    if g > 0.0 and g.is_integer() and g <= 16.0:
        n = int(g)
        scale = jnp.float32(smooth) * _int_pow(inv, n)      # (TB, 1) per-row
        return _int_pow(exp_shifted, n) * scale             # (TB, C)
    probs = exp_shifted * inv
    return jnp.float32(smooth) * jnp.power(probs, jnp.float32(g))


def _pos_coef(exp_shifted, inv, gamma_pos, on_value):
    """((1-eps)+eps/C) * (1-p)**gamma_pos (only the target column selects it)."""
    g = float(gamma_pos)
    if g == 0.0:                 # default path: scalar, zero full-tile work
        return jnp.float32(on_value)
    one_minus_p = 1.0 - exp_shifted * inv
    if g > 0.0 and g.is_integer() and g <= 16.0:
        return jnp.float32(on_value) * _int_pow(one_minus_p, int(g))
    return jnp.float32(on_value) * jnp.power(one_minus_p, jnp.float32(g))


def asl_single_label_kernel(x_ref, t_ref, o_ref, *, gamma_pos, gamma_neg, eps,
                            batch, block_rows, mask_tail):
    x = x_ref[...].astype(jnp.float32)      # (TB, C) logits tile, per-tile cast
    tgt = t_ref[...]                        # (TB, 1) int32 class ids
    tb, num_classes = x.shape

    # log-softmax over classes: a single exp pass; log / reciprocal are per-row.
    row_max = jnp.max(x, axis=-1, keepdims=True)
    shifted = x - row_max
    exp_shifted = jnp.exp(shifted)
    denom = jnp.sum(exp_shifted, axis=-1, keepdims=True)      # (TB, 1)
    log_preds = shifted - jnp.log(denom)                       # (TB, C)
    inv = 1.0 / denom                                          # (TB, 1)

    # one-hot "scatter" of the targets via lane-iota compare.
    lane_ids = jax.lax.broadcasted_iota(jnp.int32, (tb, num_classes), 1)
    is_target = lane_ids == tgt

    # fused coefficient = label-smoothing weight * asymmetric focusing weight:
    #   target column:      ((1-eps)+eps/C) * (1 - p)**gamma_pos
    #   non-target columns: (eps/C)         *  p     **gamma_neg
    smooth = eps / num_classes
    coef = jnp.where(
        is_target,
        _pos_coef(exp_shifted, inv, gamma_pos, (1.0 - eps) + smooth),
        _neg_coef(exp_shifted, inv, gamma_neg, smooth))

    per_row = -jnp.sum(coef * log_preds, axis=-1, keepdims=True)   # (TB, 1)

    if mask_tail:
        # Padded tail rows hold uninitialized data, so per_row there may be
        # inf/NaN.  Masking MUST stay a select on per_row (where picks 0.0 and
        # does not propagate NaN from the unselected branch); do NOT refactor
        # into multiply-by-0 or a sum-before-mask.
        i = pl.program_id(0)
        row_ids = i * block_rows + jax.lax.broadcasted_iota(jnp.int32, (tb, 1), 0)
        per_row = jnp.where(row_ids < batch, per_row, 0.0)

    # One partial sum per grid step, written to this step's own output block,
    # so the grid axis can be "parallel" (both TensorCores on v7x).
    o_ref[...] = jnp.sum(per_row).reshape(1, 1, 1)


def _tpu_vmem_capacity_bytes():
    try:
        return int(pltpu.get_tpu_info().vmem_capacity_bytes)
    except Exception:
        return 64 * 1024 * 1024   # conservative (v7x-sized) fallback


def _choose_block_rows(batch, num_classes, itemsize):
    # Sublane multiple for the input dtype: 8 (f32), 16 (bf16), 32 (int8/fp8).
    sub = max(8, 32 // max(int(itemsize), 1))
    if batch <= sub:
        return batch
    # Generation-aware byte budget for the per-tile f32 working set (the f32
    # intermediates, not raw input bytes, fill VMEM): ~8 MiB on 128 MiB-VMEM
    # parts (v5e/v6e), ~4 MiB on 64 MiB parts (v7x).  No hard row cap, so
    # small-C workloads still get multi-MiB tiles.
    big_vmem = _tpu_vmem_capacity_bytes() >= 96 * 1024 * 1024
    f32_tile_budget = (8 if big_vmem else 4) * 1024 * 1024
    rows = f32_tile_budget // max(num_classes * 4, 1)
    rows = max(sub, (rows // sub) * sub)
    if rows >= batch:
        return batch
    return rows


def asl_single_label(inputs, target, gamma_pos=0.0, gamma_neg=4.0, eps=0.1,
                     block_rows=None):
    """inputs: (B, C) float logits (any float dtype); target: (B,) int ids.

    Returns the mean ASL loss (reduction='mean' of the reference module).
    """
    batch, num_classes = inputs.shape
    tgt = target.astype(jnp.int32).reshape(batch, 1)

    itemsize = jnp.dtype(inputs.dtype).itemsize
    if block_rows is None:
        block_rows = _choose_block_rows(batch, num_classes, itemsize)
    block_rows = min(block_rows, batch)
    n_tiles = (batch + block_rows - 1) // block_rows
    mask_tail = (batch % block_rows) != 0

    kernel = functools.partial(
        asl_single_label_kernel,
        gamma_pos=float(gamma_pos),
        gamma_neg=float(gamma_neg),
        eps=float(eps),
        batch=batch,
        block_rows=block_rows,
        mask_tail=mask_tail,
    )

    big_vmem = _tpu_vmem_capacity_bytes() >= 96 * 1024 * 1024
    vmem_limit = (64 if big_vmem else 40) * 1024 * 1024

    cost = pl.CostEstimate(
        flops=9 * batch * num_classes,
        transcendentals=batch * num_classes + batch,
        bytes_accessed=batch * num_classes * itemsize + batch * 4 + n_tiles * 4,
    )

    partials = pl.pallas_call(
        kernel,
        out_shape=jax.ShapeDtypeStruct((n_tiles, 1, 1), jnp.float32),
        grid=(n_tiles,),
        in_specs=[
            # TODO(synk): if xprof shows the HBM fetch still exposed with the
            # larger tiles, add pipeline_mode=pl.Buffered(3) here.
            pl.BlockSpec((block_rows, num_classes), lambda i: (i, 0)),
            pl.BlockSpec((block_rows, 1), lambda i: (i, 0)),
        ],
        out_specs=pl.BlockSpec((1, 1, 1), lambda i: (i, 0, 0)),
        compiler_params=pltpu.CompilerParams(
            dimension_semantics=("parallel",),   # megacore-shardable on v7x
            vmem_limit_bytes=vmem_limit,
        ),
        cost_estimate=cost,
    )(inputs, tgt)  # no wrapper-side f32 cast: the cast happens per tile.

    # Tiny cross-tile finish (n_tiles scalars) stays in XLA.
    return jnp.sum(partials) * jnp.float32(1.0 / batch)


def _asl_reference(inputs, target, gamma_pos=0.0, gamma_neg=4.0, eps=0.1):
    """Pure-JAX mirror of the PyTorch forward (for correctness check)."""
    num_classes = inputs.shape[-1]
    log_preds = jax.nn.log_softmax(inputs.astype(jnp.float32), axis=-1)
    targets = jax.nn.one_hot(target, num_classes, dtype=jnp.float32)
    anti_targets = 1.0 - targets
    xs_pos = jnp.exp(log_preds) * targets
    xs_neg = (1.0 - jnp.exp(log_preds)) * anti_targets
    w = jnp.power(1.0 - xs_pos - xs_neg,
                  gamma_pos * targets + gamma_neg * anti_targets)
    log_preds = log_preds * w
    targets_classes = targets * (1.0 - eps) + eps / num_classes
    loss = -(targets_classes * log_preds)
    return jnp.mean(jnp.sum(loss, axis=-1))


if __name__ == "__main__":
    key = jax.random.PRNGKey(0)
    k1, k2 = jax.random.split(key)

    B, C = 32, 16  # small (batch_size, num_classes)
    inputs = jax.random.normal(k1, (B, C), dtype=jnp.float32)
    target = jax.random.randint(k2, (B,), 0, C, dtype=jnp.int32)

    # Tiled path: 4 "parallel" grid steps of 8 rows, per-tile partial sums.
    loss_tiled = jax.block_until_ready(
        asl_single_label(inputs, target, block_rows=8))
    # Padded-tail path: 2 tiles of 24 rows, last tile masked.
    loss_tail = jax.block_until_ready(
        asl_single_label(inputs, target, block_rows=24))
    # Auto tile-size path (single tile for this small batch).
    loss_auto = jax.block_until_ready(asl_single_label(inputs, target))
    # bf16 inputs: per-tile in-kernel cast, sublane-16-aware tile rounding.
    loss_bf16 = jax.block_until_ready(
        asl_single_label(inputs.astype(jnp.bfloat16), target))

    ref = jax.block_until_ready(_asl_reference(inputs, target))
    ref_bf16 = jax.block_until_ready(
        _asl_reference(inputs.astype(jnp.bfloat16), target))

    assert jnp.allclose(loss_tiled, ref, rtol=1e-5, atol=1e-5), (loss_tiled, ref)
    assert jnp.allclose(loss_tail, ref, rtol=1e-5, atol=1e-5), (loss_tail, ref)
    assert jnp.allclose(loss_auto, ref, rtol=1e-5, atol=1e-5), (loss_auto, ref)
    assert jnp.allclose(loss_bf16, ref_bf16, rtol=1e-4, atol=1e-4), (loss_bf16,
                                                                     ref_bf16)
    print("KERNEL_OK")
</pallas_src>

<mosaic_0001>
module attributes {stable_mosaic.version = 11 : i64} {
  func.func @asl_single_label_kernel(%arg0: i32, %arg1: memref<8x16xf32, #tpu.memory_space<vmem>>, %arg2: memref<8x1xi32, #tpu.memory_space<vmem>>, %arg3: memref<1x1x1xf32, #tpu.memory_space<vmem>>) attributes {dimension_semantics = [#tpu.dimension_semantics<parallel>], iteration_bounds = array<i64: 4>, scalar_prefetch = 0 : i64, scratch_operands = 0 : i64, tpu.core_type = #tpu.core_type<tc>, window_params = [{transform_indices = @transform_0, window_bounds = array<i64: 8, 16>}, {transform_indices = @transform_1, window_bounds = array<i64: 8, 1>}, {transform_indices = @transform_2, window_bounds = array<i64: 1, 1, 1>}]} {
    %c0 = arith.constant 0 : index
    %c0_0 = arith.constant 0 : index
    %0 = vector.load %arg1[%c0, %c0_0] : memref<8x16xf32, #tpu.memory_space<vmem>>, vector<8x16xf32>
    %c0_1 = arith.constant 0 : index
    %c0_2 = arith.constant 0 : index
    %1 = vector.load %arg2[%c0_1, %c0_2] : memref<8x1xi32, #tpu.memory_space<vmem>>, vector<8x1xi32>
    %cst = arith.constant dense<0xFF800000> : vector<8xf32>
    %2 = vector.multi_reduction <maximumf>, %0, %cst [1] : vector<8x16xf32> to vector<8xf32>
    %3 = vector.shape_cast %2 : vector<8xf32> to vector<8x1xf32>
    %4 = vector.broadcast %3 : vector<8x1xf32> to vector<8x16xf32>
    %5 = arith.subf %0, %4 : vector<8x16xf32>
    %6 = math.exp %5 : vector<8x16xf32>
    %cst_3 = arith.constant dense<0.000000e+00> : vector<8xf32>
    %7 = vector.multi_reduction <add>, %6, %cst_3 [1] : vector<8x16xf32> to vector<8xf32>
    %8 = vector.shape_cast %7 : vector<8xf32> to vector<8x1xf32>
    %9 = math.log %8 : vector<8x1xf32>
    %10 = vector.broadcast %9 : vector<8x1xf32> to vector<8x16xf32>
    %11 = arith.subf %5, %10 : vector<8x16xf32>
    %cst_4 = arith.constant 1.000000e+00 : f32
    %12 = vector.broadcast %cst_4 : f32 to vector<8x1xf32>
    %13 = arith.divf %12, %8 : vector<8x1xf32>
    %14 = tpu.iota {dimensions = array<i32: 1>} : vector<8x16xi32>
    %15 = vector.broadcast %1 : vector<8x1xi32> to vector<8x16xi32>
    %16 = arith.cmpi eq, %14, %15 : vector<8x16xi32>
    %17 = arith.mulf %13, %13 : vector<8x1xf32>
    %18 = arith.mulf %17, %17 : vector<8x1xf32>
    %cst_5 = arith.constant 6.250000e-03 : f32
    %19 = vector.broadcast %cst_5 : f32 to vector<8x1xf32>
    %20 = arith.mulf %19, %18 : vector<8x1xf32>
    %21 = arith.mulf %6, %6 : vector<8x16xf32>
    %22 = arith.mulf %21, %21 : vector<8x16xf32>
    %23 = vector.broadcast %20 : vector<8x1xf32> to vector<8x16xf32>
    %24 = arith.mulf %22, %23 : vector<8x16xf32>
    %cst_6 = arith.constant 9.062500e-01 : f32
    %25 = vector.broadcast %cst_6 : f32 to vector<8x16xf32>
    %26 = arith.select %16, %25, %24 : vector<8x16xi1>, vector<8x16xf32>
    %27 = arith.mulf %26, %11 : vector<8x16xf32>
    %cst_7 = arith.constant dense<0.000000e+00> : vector<8xf32>
    %28 = vector.multi_reduction <add>, %27, %cst_7 [1] : vector<8x16xf32> to vector<8xf32>
    %29 = vector.shape_cast %28 : vector<8xf32> to vector<8x1xf32>
    %cst_8 = arith.constant 0.000000e+00 : f32
    %30 = vector.broadcast %cst_8 : f32 to vector<8x1xf32>
    %31 = arith.subf %30, %29 : vector<8x1xf32>
    %32 = vector.shape_cast %31 : vector<8x1xf32> to vector<1x8x1xf32>
    %cst_9 = arith.constant dense<0.000000e+00> : vector<1xf32>
    %33 = vector.multi_reduction <add>, %32, %cst_9 [1, 2] : vector<1x8x1xf32> to vector<1xf32>
    %34 = vector.shape_cast %33 : vector<1xf32> to vector<1x1x1xf32>
    %35 = vector.extract %34[0, 0, 0] : f32 from vector<1x1x1xf32>
    %36 = vector.broadcast %35 : f32 to vector<1x1x1xf32>
    %c0_10 = arith.constant 0 : index
    %c0_11 = arith.constant 0 : index
    %c0_12 = arith.constant 0 : index
    %37 = vector.load %arg3[%c0_10, %c0_11, %c0_12] : memref<1x1x1xf32, #tpu.memory_space<vmem>>, vector<1x1x1xf32>
    tpu.vector_store %arg3[%c0_10, %c0_11, %c0_12], %36 {strides = array<i32>} : memref<1x1x1xf32, #tpu.memory_space<vmem>>, vector<1x1x1xf32>,
    return
  }
  func.func @transform_0(%arg0: i32) -> (i32, i32) {
    %c0_i32 = arith.constant 0 : i32
    %c0_i32_0 = arith.constant 0 : i32
    return %arg0, %c0_i32 : i32, i32
  }
  func.func @transform_1(%arg0: i32) -> (i32, i32) {
    %c0_i32 = arith.constant 0 : i32
    %c0_i32_0 = arith.constant 0 : i32
    return %arg0, %c0_i32 : i32, i32
  }
  func.func @transform_2(%arg0: i32) -> (i32, i32, i32) {
    %c0_i32 = arith.constant 0 : i32
    %c0_i32_0 = arith.constant 0 : i32
    %c0_i32_1 = arith.constant 0 : i32
    return %arg0, %c0_i32, %c0_i32_0 : i32, i32, i32
  }
}

</mosaic_0001>

<bundles_post_ra>
// kernel: tpu_custom_call.1
= control target key start
LH: loop header
LB: loop body
LE: loop exit
PB: predicated region body
PF: predicated region fallthrough
CT: control target
= control target key end

     0   :  { %s314_s9 = smov 0   ;;  %s341_s0 = inlined_call_operand.vmem [shape: f32[32,16], index: 0, kind: input, shape index: {}]   ;;  %s342_s1 = inlined_call_operand.vmem [shape: s32[32,1], index: 1, kind: input, shape index: {}]   ;;  %s343_s2 = inlined_call_operand.vmem [shape: f32[4,1,1], index: 2, kind: output, shape index: {}]  }
   0x1 LB: > { %s262_s10 = sadd.s32 4294967295, %s296_s9   ;;  %p266_p0 = scmp.ge.s32.totalorder %s296_s9, 1  ;;  %s296_s9 = sphi %s314_s9, %s12_s9  }
   0x2   : > { %p120_p1 = scmp.lt.s32.totalorder %s296_s9, 5 }
   0x4   : > { %p121_p2 = pnand %p266_p0, %p120_p1 }
   0x5   : > { %p143_p3 = scmp.lt.s32.totalorder (!%p121_p2), %s262_s10, 3  ;;  %vm156_vm0 = vcmask (!%p121_p2), 130048   ;;  %v298_v2 = vmov (!%p121_p2), 0   ;;  %v171_v10 = vlaneseq (!%p121_p2)  ;;  %vm189_vm2 = vcmask (!%p121_p2), 7168  }
   0x6   : > { %124 = sbr.rel (%p121_p2) target bundleno = 692 (0x2b4), region = 28  ;;  %282 = vset.pattern.permute.xlu1 (!%p121_p2), %v298_v2  ;;  %283 = vset.pattern.permute.xlu0 (!%p121_p2), %v298_v2  ;;  %vm201_vm3 = vcmask (!%p121_p2), 0  }
   0x7   : > { %v172_v15 = vand.u32 (!%p121_p2), 127, %v171_v10 }
   0xd   : > { %s345_s10 = smov (!%p143_p3, %s262_s10), 3 }
   0xe   : > { %s267_s11 = sshll.u32 %s345_s10, 3  ;;  %s153_s20 = scalar_lea.vmem %s343_s2, %s345_s10 }
   0xf   : > { %s146_s14 = scalar_lea.vmem %s341_s0, %s267_s11  ;;  %s150_s17 = scalar_lea.vmem %s342_s1, %s267_s11 }
  0x10   : > { %v154_v0 = vld [vmem:[%s146_s14] sm:$0xff] }
  0x11   : > { %v157_v1 = vsel %vm156_vm0, %v154_v0, -inf  ;;  %v155_v3 = vld [vmem:[%s150_s17] sm:$0xff] }
  0x12   : > { %158 = vmax.xlane.f32.xlu0 %v157_v1  ;;  %174 = vperm.xlu1 %282, %v155_v3  }
  0x91   : > { %v175_v17 = vpop.permute.xlu1 %174 }
  0x92   : > { %vm176_vm1 = vcmp.eq.s32.totalorder %v172_v15, %v175_v17 }
  0x9f   : > { %v159_v4 = vpop.xlane.xlu0 %158 }
  0xa0   : > { %v160_v5 = vsub.f32 %v154_v0, %v159_v4 }
  0xa2   : > { %v161_v6 = vmul.f32 1.442695, %v160_v5 }
  0xa4   : > { %284 = vpow2.f32 %v161_v6 }
  0xae   : > { %v285_v7 = vpop.eup %284 }
  0xaf   : > { %v163_v8 = vsel %vm156_vm0, %v285_v7, 0.0  ;;  %v180_v14 = vmul.f32 %v285_v7, %v285_v7 }
  0xb0   : > { %164 = vadd.xlane.f32.xlu0 %v163_v8 }
  0xb1   : > { %v181_v20 = vmul.f32 %v180_v14, %v180_v14 }
 0x13d   : > { %v165_v9 = vpop.xlane.xlu0 %164 }
 0x13e   : > { %286 = vrcp.f32 %v165_v9 }
 0x13f   : > { %288 = vlog2.f32 %v165_v9 }
 0x148   : > { %v287_v11 = vpop.eup %286 }
 0x149   : > { %v289_v12 = vpop.eup %288  ;;  %v177_v13 = vmul.f32 %v287_v11, %v287_v11 }
 0x14a   : > { %v167_v18 = vmul.f32 0.6931472, %v289_v12 }
 0x14b   : > { %v178_v16 = vmul.f32 %v177_v13, %v177_v13 }
 0x14c   : > { %v168_v22 = vsub.f32 %v160_v5, %v167_v18 }
 0x14d   : > { %v179_v19 = vmul.f32 0.00625, %v178_v16 }
 0x14f   : > { %v182_v21 = vmul.f32 %v181_v20, %v179_v19 }
 0x151   : > { %v183_v23 = vsel %vm176_vm1, 0.90625, %v182_v21 }
 0x152   : > { %v184_v24 = vmul.f32 %v183_v23, %v168_v22 }
 0x154   : > { %v185_v25 = vsel %vm156_vm0, %v184_v24, 0.0 }
 0x155   : > { %186 = vadd.xlane.f32.xlu1 %v185_v25 }
 0x1e2   : > { %v187_v26 = vpop.xlane.xlu1 %186 }
 0x1e3   : > { %v188_v27 = vsub.f32 0.0, %v187_v26 }
 0x1e5   : > { %v190_v28 = vsel %vm189_vm2, %v188_v27, 0.0 }
 0x1e6   : > { %191 = vadd.xlane.f32.xlu0 %v190_v28 }
 0x273   : > { %v192_v29 = vpop.xlane.xlu0 %191 }
 0x274   : > { %v193_v30 = vrot.slane %v192_v29, 4 }
 0x276   : > { %v194_v31 = vadd.f32 %v193_v30, %v192_v29 }
 0x278   : > { %v195_v32 = vrot.slane %v194_v31, 2 }
 0x27a   : > { %v196_v33 = vadd.f32 %v195_v32, %v194_v31 }
 0x27c   : > { %v197_v34 = vrot.slane %v196_v33, 1 }
 0x27e   : > { %v198_v35 = vadd.f32 %v197_v34, %v196_v33 }
 0x280   : > { %271 = vpush %v198_v35 }
 0x2b1   : > { %s272_s21 = spop %271 }
 0x2b2   : > { %v200_v36 = vstv %s272_s21 }
 0x2b3   : > { %202 = vst.msk [vmem:[%s153_s20] sm:$0x1] %vm201_vm3, %v200_v36 }
 0x2b4 PF: > { %s12_s9 = sadd.s32 1, %s296_s9  }
 0x2b5   : > { %p9_p4 = scmp.ge.s32.totalorder %s12_s9, 6  }
 0x2b7   :  { %11 = sbr.rel (!%p9_p4) target bundleno = 1 (0x1), region = 61 }

</bundles_post_ra>
